<compile_context>
chip_gen: v6e
topology: v6e:2x2x1
jax: 0.10.0
libtpu: 0.0.40
codegen_flags: <defaults>
</compile_context>

<pallas_src>
import functools

import jax
import jax.numpy as jnp
from jax.experimental import pallas as pl
from jax.experimental.pallas import tpu as pltpu


def _loss_kernel(x_ref, t_ref, out_ref, a_sc, b_sc, c_sc, e_sc, *,
                 loss_weight, n_rows, inv_n, tm, ragged):
    c = pl.program_id(1)

    @pl.when(c == 0)
    def _():
        a_sc[...] = jnp.zeros_like(a_sc)
        b_sc[...] = jnp.zeros_like(b_sc)
        c_sc[...] = jnp.zeros_like(c_sc)
        e_sc[...] = jnp.zeros_like(e_sc)

    x = x_ref[0].astype(jnp.float32)          # (tm, 128), f32 accumulation
    t = t_ref[0].astype(jnp.float32)

    sx = jax.nn.sigmoid(x)                    # EUP

    if ragged:
        # Last chunk may read rows past the (padded) array -> mask them to 0
        # BEFORE any product/sum (sigmoid of garbage must not contribute).
        row0 = c * tm
        rows = jax.lax.broadcasted_iota(jnp.int32, (tm, 128), 0) + row0
        valid = rows < n_rows
        sx = jnp.where(valid, sx, 0.0)
        t = jnp.where(valid, t, 0.0)

    diff = sx - t

    def fold(v):
        # (tm,128) -> (8,128): vreg-wise adds only (no cross-lane XLU work).
        return jnp.sum(v.reshape(tm // 8, 8, 128), axis=0)

    a_sc[...] += fold(sx * t)                 # sum(x * t)
    b_sc[...] += fold(sx * sx)                # sum(x * x)
    c_sc[...] += fold(t * t)                  # sum(t * t)
    e_sc[...] += fold(diff * diff)            # sum((x - t)^2)

    @pl.when(c == pl.num_programs(1) - 1)
    def _():
        def total(ref):
            s = jnp.sum(ref[...], axis=0, keepdims=True)   # (1, 128)
            return jnp.sum(s, axis=1, keepdims=True)       # (1, 1)

        a = total(a_sc)
        b = total(b_sc) + 0.001
        cc = total(c_sc) + 0.001
        e = total(e_sc)
        dice = loss_weight * (1.0 - 2.0 * a / (b + cc))
        val = dice + e * inv_n                              # (1, 1)
        out_ref[...] = jnp.broadcast_to(val, (1, 1, 128))


def loss_forward(input, target, loss_weight=1.0):
    """Pallas implementation of Loss.forward (scalar = mean dice + mean MSE)."""
    batch_size = input.shape[0]
    n = 1
    for s in input.shape[1:]:
        n *= s

    x = input.reshape(batch_size, n)
    t = target.reshape(batch_size, n)
    # Keep HBM bytes minimal: no f32 upcast here (kernel casts in-register).
    if not jnp.issubdtype(t.dtype, jnp.floating):
        t = t.astype(x.dtype)

    # Pad flat feature dim to a multiple of 1024 (=8*128) with values that
    # contribute exactly zero: sigmoid(-1e9) == 0.0 in f32, target pad == 0.
    n_pad = (-n) % 1024
    if n_pad:
        x = jnp.pad(x, ((0, 0), (0, n_pad)), constant_values=-1e9)
        t = jnp.pad(t, ((0, 0), (0, n_pad)), constant_values=0)
    n_rows = (n + n_pad) // 128                    # multiple of 8
    x = x.reshape(batch_size, n_rows, 128)
    t = t.reshape(batch_size, n_rows, 128)

    # Tile selection: keep both double-buffered input blocks within ~16 MiB
    # total (safe on v7x's 64 MiB physical / 32 MiB scoped VMEM as well as
    # v5e/v6e), i.e. ~4 MiB per f32 input block.
    in_bytes_per_row = 128 * (x.dtype.itemsize + t.dtype.itemsize)
    input_budget_bytes = 16 * 1024 * 1024
    tm = input_budget_bytes // (2 * in_bytes_per_row)
    tm = max(8, (tm // 8) * 8)
    tm = min(tm, n_rows)                           # both multiples of 8

    n_chunks = pl.cdiv(n_rows, tm)
    ragged = (n_rows % tm) != 0

    kernel = functools.partial(
        _loss_kernel,
        loss_weight=float(loss_weight),
        n_rows=n_rows,
        inv_n=1.0 / float(n),                      # divide by ORIGINAL N
        tm=tm,
        ragged=ragged,
    )

    out = pl.pallas_call(
        kernel,
        out_shape=jax.ShapeDtypeStruct((batch_size, 1, 128), jnp.float32),
        grid_spec=pltpu.PrefetchScalarGridSpec(
            num_scalar_prefetch=0,
            grid=(batch_size, n_chunks),
            in_specs=[
                pl.BlockSpec((1, tm, 128), lambda b, c: (b, c, 0)),
                pl.BlockSpec((1, tm, 128), lambda b, c: (b, c, 0)),
            ],
            out_specs=pl.BlockSpec((1, 1, 128), lambda b, c: (b, 0, 0)),
            scratch_shapes=[
                pltpu.VMEM((8, 128), jnp.float32),
                pltpu.VMEM((8, 128), jnp.float32),
                pltpu.VMEM((8, 128), jnp.float32),
                pltpu.VMEM((8, 128), jnp.float32),
            ],
        ),
        compiler_params=pltpu.CompilerParams(
            dimension_semantics=("parallel", "arbitrary"),
            vmem_limit_bytes=48 * 1024 * 1024,
        ),
    )(x, t)

    per_batch = out[:, 0, 0]          # dice_b + per-batch MSE mean
    return jnp.mean(per_batch)


def _reference_loss(input, target, loss_weight=1.0):
    b = input.shape[0]
    x = jax.nn.sigmoid(input.astype(jnp.float32))
    t = target.astype(jnp.float32)
    xf = x.reshape(b, -1)
    tf = t.reshape(b, -1)
    a = jnp.sum(xf * tf, axis=1)
    bb = jnp.sum(xf * xf, axis=1) + 0.001
    cc = jnp.sum(tf * tf, axis=1) + 0.001
    dice = loss_weight * (1.0 - 2.0 * a / (bb + cc))
    # MSELoss(reduce=False)(sigmoid(x), t).mean([1,2]).mean() == overall mean
    l2 = jnp.mean((x - t) ** 2)
    return jnp.mean(dice) + l2


if __name__ == "__main__":
    key = jax.random.PRNGKey(0)
    k1, k2 = jax.random.split(key)

    # NCHW-style segmentation logit / mask pair.
    B, C, H, W = 2, 4, 16, 16
    logits = jax.random.normal(k1, (B, C, H, W), dtype=jnp.float32)
    target = (jax.random.uniform(k2, (B, C, H, W)) > 0.5).astype(jnp.float32)

    out = jax.block_until_ready(loss_forward(logits, target))
    ref = _reference_loss(logits, target)
    assert jnp.allclose(out, ref, atol=1e-5, rtol=1e-5), (out, ref)

    print("KERNEL_OK")
</pallas_src>

<mosaic_0001>
module attributes {stable_mosaic.version = 11 : i64} {
  func.func @_loss_kernel(%arg0: i32, %arg1: i32, %arg2: memref<1x8x128xf32, #tpu.memory_space<vmem>>, %arg3: memref<1x8x128xf32, #tpu.memory_space<vmem>>, %arg4: memref<1x1x128xf32, #tpu.memory_space<vmem>>, %arg5: memref<8x128xf32, #tpu.memory_space<vmem>>, %arg6: memref<8x128xf32, #tpu.memory_space<vmem>>, %arg7: memref<8x128xf32, #tpu.memory_space<vmem>>, %arg8: memref<8x128xf32, #tpu.memory_space<vmem>>) attributes {dimension_semantics = [#tpu.dimension_semantics<parallel>, #tpu.dimension_semantics<arbitrary>], iteration_bounds = array<i64: 2, 1>, scalar_prefetch = 0 : i64, scratch_operands = 4 : i64, tpu.core_type = #tpu.core_type<tc>, window_params = [{transform_indices = @transform_0, window_bounds = array<i64: 1, 8, 128>}, {transform_indices = @transform_1, window_bounds = array<i64: 1, 8, 128>}, {transform_indices = @transform_2, window_bounds = array<i64: 1, 1, 128>}]} {
    %c0_i32 = arith.constant 0 : i32
    %0 = arith.cmpi eq, %arg1, %c0_i32 : i32
    %1 = arith.extui %0 : i1 to i32
    %c0_i32_0 = arith.constant 0 : i32
    %2 = arith.cmpi ne, %1, %c0_i32_0 : i32
    scf.if %2 {
      %cst_28 = arith.constant 0.000000e+00 : f32
      %40 = vector.broadcast %cst_28 : f32 to vector<8x128xf32>
      %c0_29 = arith.constant 0 : index
      %c0_30 = arith.constant 0 : index
      %41 = vector.load %arg5[%c0_29, %c0_30] : memref<8x128xf32, #tpu.memory_space<vmem>>, vector<8x128xf32>
      tpu.vector_store %arg5[%c0_29, %c0_30], %40 {strides = array<i32>} : memref<8x128xf32, #tpu.memory_space<vmem>>, vector<8x128xf32>,
      %cst_31 = arith.constant 0.000000e+00 : f32
      %42 = vector.broadcast %cst_31 : f32 to vector<8x128xf32>
      %c0_32 = arith.constant 0 : index
      %c0_33 = arith.constant 0 : index
      %43 = vector.load %arg6[%c0_32, %c0_33] : memref<8x128xf32, #tpu.memory_space<vmem>>, vector<8x128xf32>
      tpu.vector_store %arg6[%c0_32, %c0_33], %42 {strides = array<i32>} : memref<8x128xf32, #tpu.memory_space<vmem>>, vector<8x128xf32>,
      %cst_34 = arith.constant 0.000000e+00 : f32
      %44 = vector.broadcast %cst_34 : f32 to vector<8x128xf32>
      %c0_35 = arith.constant 0 : index
      %c0_36 = arith.constant 0 : index
      %45 = vector.load %arg7[%c0_35, %c0_36] : memref<8x128xf32, #tpu.memory_space<vmem>>, vector<8x128xf32>
      tpu.vector_store %arg7[%c0_35, %c0_36], %44 {strides = array<i32>} : memref<8x128xf32, #tpu.memory_space<vmem>>, vector<8x128xf32>,
      %cst_37 = arith.constant 0.000000e+00 : f32
      %46 = vector.broadcast %cst_37 : f32 to vector<8x128xf32>
      %c0_38 = arith.constant 0 : index
      %c0_39 = arith.constant 0 : index
      %47 = vector.load %arg8[%c0_38, %c0_39] : memref<8x128xf32, #tpu.memory_space<vmem>>, vector<8x128xf32>
      tpu.vector_store %arg8[%c0_38, %c0_39], %46 {strides = array<i32>} : memref<8x128xf32, #tpu.memory_space<vmem>>, vector<8x128xf32>,
    } else {
    }
    %c0 = arith.constant 0 : index
    %c0_1 = arith.constant 0 : index
    %c0_2 = arith.constant 0 : index
    %3 = vector.load %arg2[%c0, %c0_1, %c0_2] : memref<1x8x128xf32, #tpu.memory_space<vmem>>, vector<1x8x128xf32>
    %4 = vector.shape_cast %3 : vector<1x8x128xf32> to vector<8x128xf32>
    %c0_3 = arith.constant 0 : index
    %c0_4 = arith.constant 0 : index
    %c0_5 = arith.constant 0 : index
    %5 = vector.load %arg3[%c0_3, %c0_4, %c0_5] : memref<1x8x128xf32, #tpu.memory_space<vmem>>, vector<1x8x128xf32>
    %6 = vector.shape_cast %5 : vector<1x8x128xf32> to vector<8x128xf32>
    %7 = arith.negf %4 : vector<8x128xf32>
    %8 = math.exp %7 : vector<8x128xf32>
    %cst = arith.constant 1.000000e+00 : f32
    %9 = vector.broadcast %cst : f32 to vector<8x128xf32>
    %10 = arith.addf %9, %8 : vector<8x128xf32>
    %11 = arith.divf %9, %10 : vector<8x128xf32>
    %12 = arith.subf %11, %6 : vector<8x128xf32>
    %c0_6 = arith.constant 0 : index
    %c0_7 = arith.constant 0 : index
    %13 = vector.load %arg5[%c0_6, %c0_7] : memref<8x128xf32, #tpu.memory_space<vmem>>, vector<8x128xf32>
    %14 = arith.mulf %11, %6 : vector<8x128xf32>
    %15 = vector.shape_cast %14 : vector<8x128xf32> to vector<1x8x128xf32>
    %cst_8 = arith.constant dense<0.000000e+00> : vector<8x128xf32>
    %16 = vector.multi_reduction <add>, %15, %cst_8 [0] : vector<1x8x128xf32> to vector<8x128xf32>
    %17 = arith.addf %13, %16 : vector<8x128xf32>
    %c0_9 = arith.constant 0 : index
    %c0_10 = arith.constant 0 : index
    %18 = vector.load %arg5[%c0_9, %c0_10] : memref<8x128xf32, #tpu.memory_space<vmem>>, vector<8x128xf32>
    tpu.vector_store %arg5[%c0_9, %c0_10], %17 {strides = array<i32>} : memref<8x128xf32, #tpu.memory_space<vmem>>, vector<8x128xf32>,
    %c0_11 = arith.constant 0 : index
    %c0_12 = arith.constant 0 : index
    %19 = vector.load %arg6[%c0_11, %c0_12] : memref<8x128xf32, #tpu.memory_space<vmem>>, vector<8x128xf32>
    %20 = arith.mulf %11, %11 : vector<8x128xf32>
    %21 = vector.shape_cast %20 : vector<8x128xf32> to vector<1x8x128xf32>
    %cst_13 = arith.constant dense<0.000000e+00> : vector<8x128xf32>
    %22 = vector.multi_reduction <add>, %21, %cst_13 [0] : vector<1x8x128xf32> to vector<8x128xf32>
    %23 = arith.addf %19, %22 : vector<8x128xf32>
    %c0_14 = arith.constant 0 : index
    %c0_15 = arith.constant 0 : index
    %24 = vector.load %arg6[%c0_14, %c0_15] : memref<8x128xf32, #tpu.memory_space<vmem>>, vector<8x128xf32>
    tpu.vector_store %arg6[%c0_14, %c0_15], %23 {strides = array<i32>} : memref<8x128xf32, #tpu.memory_space<vmem>>, vector<8x128xf32>,
    %c0_16 = arith.constant 0 : index
    %c0_17 = arith.constant 0 : index
    %25 = vector.load %arg7[%c0_16, %c0_17] : memref<8x128xf32, #tpu.memory_space<vmem>>, vector<8x128xf32>
    %26 = arith.mulf %6, %6 : vector<8x128xf32>
    %27 = vector.shape_cast %26 : vector<8x128xf32> to vector<1x8x128xf32>
    %cst_18 = arith.constant dense<0.000000e+00> : vector<8x128xf32>
    %28 = vector.multi_reduction <add>, %27, %cst_18 [0] : vector<1x8x128xf32> to vector<8x128xf32>
    %29 = arith.addf %25, %28 : vector<8x128xf32>
    %c0_19 = arith.constant 0 : index
    %c0_20 = arith.constant 0 : index
    %30 = vector.load %arg7[%c0_19, %c0_20] : memref<8x128xf32, #tpu.memory_space<vmem>>, vector<8x128xf32>
    tpu.vector_store %arg7[%c0_19, %c0_20], %29 {strides = array<i32>} : memref<8x128xf32, #tpu.memory_space<vmem>>, vector<8x128xf32>,
    %c0_21 = arith.constant 0 : index
    %c0_22 = arith.constant 0 : index
    %31 = vector.load %arg8[%c0_21, %c0_22] : memref<8x128xf32, #tpu.memory_space<vmem>>, vector<8x128xf32>
    %32 = arith.mulf %12, %12 : vector<8x128xf32>
    %33 = vector.shape_cast %32 : vector<8x128xf32> to vector<1x8x128xf32>
    %cst_23 = arith.constant dense<0.000000e+00> : vector<8x128xf32>
    %34 = vector.multi_reduction <add>, %33, %cst_23 [0] : vector<1x8x128xf32> to vector<8x128xf32>
    %35 = arith.addf %31, %34 : vector<8x128xf32>
    %c0_24 = arith.constant 0 : index
    %c0_25 = arith.constant 0 : index
    %36 = vector.load %arg8[%c0_24, %c0_25] : memref<8x128xf32, #tpu.memory_space<vmem>>, vector<8x128xf32>
    tpu.vector_store %arg8[%c0_24, %c0_25], %35 {strides = array<i32>} : memref<8x128xf32, #tpu.memory_space<vmem>>, vector<8x128xf32>,
    %c0_i32_26 = arith.constant 0 : i32
    %37 = arith.cmpi eq, %arg1, %c0_i32_26 : i32
    %38 = arith.extui %37 : i1 to i32
    %c0_i32_27 = arith.constant 0 : i32
    %39 = arith.cmpi ne, %38, %c0_i32_27 : i32
    scf.if %39 {
      %c0_28 = arith.constant 0 : index
      %c0_29 = arith.constant 0 : index
      %40 = vector.load %arg5[%c0_28, %c0_29] : memref<8x128xf32, #tpu.memory_space<vmem>>, vector<8x128xf32>
      %cst_30 = arith.constant dense<0.000000e+00> : vector<128xf32>
      %41 = vector.multi_reduction <add>, %40, %cst_30 [0] : vector<8x128xf32> to vector<128xf32>
      %42 = vector.shape_cast %41 : vector<128xf32> to vector<1x128xf32>
      %cst_31 = arith.constant dense<0.000000e+00> : vector<1xf32>
      %43 = vector.multi_reduction <add>, %42, %cst_31 [1] : vector<1x128xf32> to vector<1xf32>
      %44 = vector.shape_cast %43 : vector<1xf32> to vector<1x1xf32>
      %c0_32 = arith.constant 0 : index
      %c0_33 = arith.constant 0 : index
      %45 = vector.load %arg6[%c0_32, %c0_33] : memref<8x128xf32, #tpu.memory_space<vmem>>, vector<8x128xf32>
      %cst_34 = arith.constant dense<0.000000e+00> : vector<128xf32>
      %46 = vector.multi_reduction <add>, %45, %cst_34 [0] : vector<8x128xf32> to vector<128xf32>
      %47 = vector.shape_cast %46 : vector<128xf32> to vector<1x128xf32>
      %cst_35 = arith.constant dense<0.000000e+00> : vector<1xf32>
      %48 = vector.multi_reduction <add>, %47, %cst_35 [1] : vector<1x128xf32> to vector<1xf32>
      %49 = vector.shape_cast %48 : vector<1xf32> to vector<1x1xf32>
      %cst_36 = arith.constant 1.000000e-03 : f32
      %50 = vector.broadcast %cst_36 : f32 to vector<1x1xf32>
      %51 = arith.addf %49, %50 : vector<1x1xf32>
      %c0_37 = arith.constant 0 : index
      %c0_38 = arith.constant 0 : index
      %52 = vector.load %arg7[%c0_37, %c0_38] : memref<8x128xf32, #tpu.memory_space<vmem>>, vector<8x128xf32>
      %cst_39 = arith.constant dense<0.000000e+00> : vector<128xf32>
      %53 = vector.multi_reduction <add>, %52, %cst_39 [0] : vector<8x128xf32> to vector<128xf32>
      %54 = vector.shape_cast %53 : vector<128xf32> to vector<1x128xf32>
      %cst_40 = arith.constant dense<0.000000e+00> : vector<1xf32>
      %55 = vector.multi_reduction <add>, %54, %cst_40 [1] : vector<1x128xf32> to vector<1xf32>
      %56 = vector.shape_cast %55 : vector<1xf32> to vector<1x1xf32>
      %cst_41 = arith.constant 1.000000e-03 : f32
      %57 = vector.broadcast %cst_41 : f32 to vector<1x1xf32>
      %58 = arith.addf %56, %57 : vector<1x1xf32>
      %c0_42 = arith.constant 0 : index
      %c0_43 = arith.constant 0 : index
      %59 = vector.load %arg8[%c0_42, %c0_43] : memref<8x128xf32, #tpu.memory_space<vmem>>, vector<8x128xf32>
      %cst_44 = arith.constant dense<0.000000e+00> : vector<128xf32>
      %60 = vector.multi_reduction <add>, %59, %cst_44 [0] : vector<8x128xf32> to vector<128xf32>
      %61 = vector.shape_cast %60 : vector<128xf32> to vector<1x128xf32>
      %cst_45 = arith.constant dense<0.000000e+00> : vector<1xf32>
      %62 = vector.multi_reduction <add>, %61, %cst_45 [1] : vector<1x128xf32> to vector<1xf32>
      %63 = vector.shape_cast %62 : vector<1xf32> to vector<1x1xf32>
      %cst_46 = arith.constant 2.000000e+00 : f32
      %64 = vector.broadcast %cst_46 : f32 to vector<1x1xf32>
      %65 = arith.mulf %64, %44 : vector<1x1xf32>
      %66 = arith.addf %51, %58 : vector<1x1xf32>
      %67 = arith.divf %65, %66 : vector<1x1xf32>
      %cst_47 = arith.constant 1.000000e+00 : f32
      %68 = vector.broadcast %cst_47 : f32 to vector<1x1xf32>
      %69 = arith.subf %68, %67 : vector<1x1xf32>
      %cst_48 = arith.constant 1.000000e+00 : f32
      %70 = vector.broadcast %cst_48 : f32 to vector<1x1xf32>
      %71 = arith.mulf %70, %69 : vector<1x1xf32>
      %cst_49 = arith.constant 9.765625E-4 : f32
      %72 = vector.broadcast %cst_49 : f32 to vector<1x1xf32>
      %73 = arith.mulf %63, %72 : vector<1x1xf32>
      %74 = arith.addf %71, %73 : vector<1x1xf32>
      %75 = vector.shape_cast %74 : vector<1x1xf32> to vector<1x1x1xf32>
      %76 = vector.broadcast %75 : vector<1x1x1xf32> to vector<1x1x128xf32>
      %c0_50 = arith.constant 0 : index
      %c0_51 = arith.constant 0 : index
      %c0_52 = arith.constant 0 : index
      %77 = vector.load %arg4[%c0_50, %c0_51, %c0_52] : memref<1x1x128xf32, #tpu.memory_space<vmem>>, vector<1x1x128xf32>
      tpu.vector_store %arg4[%c0_50, %c0_51, %c0_52], %76 {strides = array<i32>} : memref<1x1x128xf32, #tpu.memory_space<vmem>>, vector<1x1x128xf32>,
    } else {
    }
    return
  }
  func.func @transform_0(%arg0: i32, %arg1: i32) -> (i32, i32, i32) {
    %c0_i32 = arith.constant 0 : i32
    %c0_i32_0 = arith.constant 0 : i32
    return %arg0, %arg1, %c0_i32 : i32, i32, i32
  }
  func.func @transform_1(%arg0: i32, %arg1: i32) -> (i32, i32, i32) {
    %c0_i32 = arith.constant 0 : i32
    %c0_i32_0 = arith.constant 0 : i32
    return %arg0, %arg1, %c0_i32 : i32, i32, i32
  }
  func.func @transform_2(%arg0: i32, %arg1: i32) -> (i32, i32, i32) {
    %c0_i32 = arith.constant 0 : i32
    %c0_i32_0 = arith.constant 0 : i32
    %c0_i32_1 = arith.constant 0 : i32
    return %arg0, %c0_i32, %c0_i32_0 : i32, i32, i32
  }
}

</mosaic_0001>

<bundles_post_ra>
// kernel: tpu_custom_call.1
= control target key start
LH: loop header
LB: loop body
LE: loop exit
PB: predicated region body
PF: predicated region fallthrough
CT: control target
= control target key end

     0   :  { %7 = vsyncpa [#allocation7], 0  ;;  %s821_s0 = inlined_call_operand.hbm [shape: f32[2,8,128], index: 0, kind: input, shape index: {}]   ;;  %s822_s1 = inlined_call_operand.hbm [shape: f32[2,8,128], index: 1, kind: input, shape index: {}]   ;;  %s823_s2 = inlined_call_operand.hbm [shape: f32[2,1,128], index: 2, kind: output, shape index: {}]  }
   0x1   :  { %9 = vsyncpa [#allocation7 + $0x1], 0 }
   0x2   :  { %10 = vsyncpa [#allocation10], 0 }
   0x3   :  { %12 = vsyncpa [#allocation10 + $0x1], 0 }
   0x4   :  { %13 = vsyncpa [#allocation8], 0 }
   0x5   :  { %15 = vsyncpa [#allocation8 + $0x1], 0  ;;  %s659_s9 = smov 0   ;;  %s661_s10 = smov 0  }
   0x6   :  { %s663_s11 = smov 0   ;;  %s665_s12 = smov 0  }
   0x7   :  { %s667_s13 = smov 0   ;;  %s669_s14 = smov 0  }
   0x8 LB: > { %s411_s15 = sadd.s32 4294967295, %s639_s14   ;;  %s412_s16 = sadd.s32 4294967294, %s639_s14   ;;  %s639_s14 = sphi %s669_s14, %s21_s14   ;;  %s635_s13 = sphi %s667_s13, %s835_s13   ;;  %s631_s12 = sphi %s665_s12, %s834_s12   ;;  %s627_s11 = sphi %s663_s11, %s833_s11   ;;  %s623_s10 = sphi %s661_s10, %s832_s10   ;;  %s619_s9 = sphi %s659_s9, %s831_s9  }
   0x9   : > { %s33_s17 = sadd.s32 1, %s635_s13  ;;  %s42_s18 = sadd.s32 1, %s627_s11 }
   0xa   : > { %p35_p0 = scmp.ge.s32.totalorder %s33_s17, 2  ;;  %p49_p1 = scmp.ne.s32.totalorder %s627_s11, %s623_s10 }
   0xb   : > { %p50_p2 = scmp.eq.s32.totalorder %s639_s14, 0  ;;  %p55_p3 = scmp.ne.s32.totalorder %s623_s10, %s619_s9 }
   0xc   : > { %s837_s17 = smov (%p35_p0, %s33_s17), 0  ;;  %p56_p5 = scmp.eq.s32.totalorder %s411_s15, 0 }
   0xd   : > { %p700_p4 = por %p50_p2, %p49_p1  ;;  %s37_s20 = ssub.s32 %s635_s13, %s837_s17 }
   0xe   : > { %p107_p6 = scmp.eq.s32.totalorder %s411_s15, 1  ;;  %p40_p7 = scmp.eq.s32.totalorder %s37_s20, 0 }
   0xf   : > { %p706_p8 = por %p56_p5, %p55_p3  ;;  %p113_p10 = scmp.eq.s32.totalorder %s412_s16, 1 }
  0x10   : > { %p710_p9 = por %p107_p6, %p49_p1  ;;  %p443_p13 = scmp.lt.s32.totalorder %s639_s14, 2 }
  0x11   : > { %s715_s23 = scalar_select %p40_p7, %s627_s11, %s42_s18  }
  0x12   : > { %p717_p11 = por %p113_p10, %p55_p3  ;;  %s724_s25 = sand.u32 1, %s627_s11  }
  0x13   : > { %s415_s26 = sshll.u32 %s724_s25, 3  ;;  %s416_s27 = sshll.u32 %s635_s13, 7 }
  0x14   : > { %s143_s30 = scalar_lea.hbm %s821_s0, %s416_s27  ;;  %s137_s3 = scalar_lea.vmem [#allocation6], %s415_s26 }
  0x15   : > { %s145_s4 = sshll.u32 %s137_s3, 4  ;;  %p733_p0 = pnand %p443_p13, %p700_p4  ;;  %s146_s4 = int_to_ptr.vmem [resolvable:$true] %s145_s4 }
  0x16   : > { %p419_p1 = scmp.ge.s32.totalorder %s639_s14, 1  ;;  %p169_p2 = scmp.lt.s32.totalorder %s639_s14, 3 }
  0x17   : > { %s134_s6 = scalar_lea.sflag [#allocation7], %s724_s25  ;;  %p501_p3 = pneg %p733_p0 }
  0x18   : > { %s512_s7 = scalar_lea.vmem %s146_s4, 128  ;;  %s641_s8 = smov [#allocation6]  }
  0x19   : > { %p513_p5 = scmp.ne.s32.totalorder %s146_s4, %s512_s7  ;;  %s517_s15 = sshll.u32 %s641_s8, 4  ;;  %s518_s15 = int_to_ptr.vmem [resolvable:$false] %s517_s15 }
  0x1a   : > { %s519_s16 = scalar_lea.vmem %s518_s15, 256  ;;  %p520_p4 = scmp.lt.s32.totalorder %s146_s4, %s518_s15 }
  0x1b   : > { %p515_p6 = pnand %p513_p5, %p501_p3  ;;  %p521_p10 = scmp.lt.s32.totalorder %s519_s16, %s512_s7 }
  0x1d   : > { %p516_p7 = pneg %p515_p6  ;;  %p522_p13 = por %p521_p10, %p520_p4 }
  0x1f   : > { %p523_p12 = pnand %p522_p13, %p516_p7 }
  0x21   : > { %526 = shalt.err (!%p523_p12)
}
  0x22   : > { %435 = dma.hbm_to_vmem [thread:$0]  (!%p733_p0), %s143_s30, 128, %s146_s4, %s134_s6  }
  0x23   : > { %p751_p5 = pnand %p419_p1, %p169_p2  ;;  %s162_s28 = scalar_lea.hbm %s822_s1, %s416_s27 }
  0x24   : > { %s156_s29 = scalar_lea.vmem [#allocation9], %s415_s26  ;;  %s153_s7 = scalar_lea.sflag [#allocation10], %s724_s25 }
  0x25   : > { %s164_s3 = sshll.u32 %s156_s29, 4  ;;  %s642_s30 = smov [#allocation9]   ;;  %s165_s3 = int_to_ptr.vmem [resolvable:$true] %s164_s3 }
  0x26   : > { %s540_s8 = scalar_lea.vmem %s165_s3, 128  ;;  %s545_s4 = sshll.u32 %s642_s30, 4  ;;  %s546_s4 = int_to_ptr.vmem [resolvable:$false] %s545_s4 }
  0x27   : > { %p541_p12 = scmp.ne.s32.totalorder %s165_s3, %s540_s8  ;;  %s547_s6 = scalar_lea.vmem %s546_s4, 256 }
  0x28   : > { %p548_p1 = scmp.lt.s32.totalorder %s165_s3, %s546_s4  ;;  %p549_p2 = scmp.lt.s32.totalorder %s547_s6, %s540_s8 }
  0x29   : > { %p543_p6 = pnand %p541_p12, %p501_p3 }
  0x2a   : > { %p550_p4 = por %p549_p2, %p548_p1 }
  0x2b   : > { %p544_p7 = pneg %p543_p6 }
  0x2d   : > { %p551_p10 = pnand %p550_p4, %p544_p7 }
  0x2f   : > { %554 = shalt.err (!%p551_p10)
}
  0x30   : > { %438 = dma.hbm_to_vmem [thread:$0]  (!%p733_p0), %s162_s28, 128, %s165_s3, %s153_s7  }
  0x31   : > { %173 = sbr.rel (%p751_p5) target bundleno = 283 (0x11b), region = 28  ;;  %s767_s25 = sand.u32 (!%p751_p5), 1, %s623_s10  }
  0x32   : > { %s420_s26 = sshll.u32 (!%p751_p5), %s767_s25, 3  ;;  %s176_s27 = scalar_lea.sflag (!%p751_p5), [#allocation7], %s767_s25 }
  0x33   : > { %s179_s15 = scalar_lea.vmem (!%p751_p5), [#allocation6], %s420_s26 }
  0x36   : > { %606 = dma.done.wait (%p706_p8), %s176_s27, 128  }
  0x37   : > { %608 = vsyncadd (%p706_p8), %s176_s27, 4294967168  ;;  %s185_s5 = scalar_lea.sflag [#allocation10], %s767_s25  ;;  %s188_s16 = scalar_lea.vmem [#allocation9], %s420_s26 }
  0x38   : > { %610 = dma.done.wait (%p706_p8), %s185_s5, 128  }
  0x39   : > { %612 = vsyncadd (%p706_p8), %s185_s5, 4294967168  ;;  %v221_v0 = vld [vmem:[%s179_s15] sm:$0xff]  ;;  %v222_v4 = vld [vmem:[%s188_s16] sm:$0xff]  ;;  %s423_s21 = sshll.u32 %s631_s12, 4  ;;  %s212_s18 = scalar_lea.vmem [#allocation11], %s767_s25 }
  0x3a   : > { %v422_v1 = vmul.f32 -1.442695, %v221_v0  ;;  %v241_v5 = vmul.f32 %v222_v4, %v222_v4  ;;  %s312_s19 = sshll.u32 %s212_s18, 4  ;;  %s310_s29 = scalar_lea.hbm %s823_s2, %s423_s21  ;;  %s313_s19 = int_to_ptr.vmem [resolvable:$true] %s312_s19 }
  0x3b   : > { %s300_s3 = scalar_lea.sflag [#allocation8], %s767_s25  ;;  %s555_s7 = scalar_lea.vmem %s313_s19, 16 }
  0x3c   : > { %493 = vpow2.f32 %v422_v1  ;;  %v273_v6 = vrot.slane %v241_v5, 4  ;;  %p556_p8 = scmp.ne.s32.totalorder %s313_s19, %s555_s7  ;;  %s643_s8 = smov [#allocation11]  }
  0x3d   : > { %s559_s30 = sshll.u32 %s643_s8, 4  ;;  %s560_s30 = int_to_ptr.vmem [resolvable:$false] %s559_s30 }
  0x3e   : > { %v274_v7 = vadd.f32 %v273_v6, %v241_v5  ;;  %p557_p0 = pnand %p556_p8, %p710_p9  ;;  %s561_s12 = scalar_lea.vmem %s560_s30, 32 }
  0x3f   : > { %p562_p13 = scmp.lt.s32.totalorder %s313_s19, %s560_s30  ;;  %p563_p5 = scmp.lt.s32.totalorder %s561_s12, %s555_s7 }
  0x40   : > { %v275_v13 = vrot.slane %v274_v7, 2  ;;  %p558_p3 = pneg %p557_p0 }
  0x41   : > { %p564_p12 = por %p563_p5, %p562_p13 }
  0x42   : > { %v276_v20 = vadd.f32 %v275_v13, %v274_v7 }
  0x43   : > { %p565_p6 = pnand %p564_p12, %p558_p3 }
  0x44   : > { %v277_v27 = vrot.slane %v276_v20, 1 }
  0x46   : > { %v278_v33 = vadd.f32 %v277_v27, %v276_v20 }
  0x49   : > { %v494_v2 = vpop.eup %493 }
  0x4a   : > { %v226_v3 = vadd.f32 1.0, %v494_v2 }
  0x4c   : > { %495 = vrcp.f32 %v226_v3 }
  0x59   : > { %v496_v8 = vpop.eup %495 }
  0x5a   : > { %v236_v9 = vmul.f32 %v496_v8, %v496_v8  ;;  %v231_v10 = vmul.f32 %v496_v8, %v222_v4  ;;  %v229_v11 = vsub.f32 %v496_v8, %v222_v4 }
  0x5c   : > { %v263_v12 = vrot.slane %v236_v9, 4  ;;  %v254_v14 = vrot.slane %v231_v10, 4  ;;  %v246_v15 = vmul.f32 %v229_v11, %v229_v11 }
  0x5e   : > { %v264_v16 = vadd.f32 %v263_v12, %v236_v9  ;;  %v255_v17 = vadd.f32 %v254_v14, %v231_v10  ;;  %v283_v18 = vrot.slane %v246_v15, 4 }
  0x60   : > { %v265_v19 = vrot.slane %v264_v16, 2  ;;  %v256_v21 = vrot.slane %v255_v17, 2  ;;  %v284_v22 = vadd.f32 %v283_v18, %v246_v15 }
  0x62   : > { %v266_v23 = vadd.f32 %v265_v19, %v264_v16  ;;  %v257_v24 = vadd.f32 %v256_v21, %v255_v17  ;;  %v285_v25 = vrot.slane %v284_v22, 2 }
  0x64   : > { %v267_v26 = vrot.slane %v266_v23, 1  ;;  %v258_v28 = vrot.slane %v257_v24, 1  ;;  %v286_v29 = vadd.f32 %v285_v25, %v284_v22 }
  0x66   : > { %v268_v30 = vadd.f32 %v267_v26, %v266_v23  ;;  %v259_v31 = vadd.f32 %v258_v28, %v257_v24  ;;  %v287_v32 = vrot.slane %v286_v29, 1 }
  0x68   : > { %269 = vadd.xlane.f32.xlu0 %v268_v30  ;;  %260 = vadd.xlane.f32.xlu1 %v259_v31  ;;  %v288_v34 = vadd.f32 %v287_v32, %v286_v29 }
  0x6c   : > { %279 = vadd.xlane.f32.xlu0 %v278_v33  ;;  %289 = vadd.xlane.f32.xlu1 %v288_v34 }
  0xf1   : > { %v270_v35 = vpop.xlane.xlu0 %269  ;;  %v261_v40 = vpop.xlane.xlu1 %260 }
  0xf2   : > { %v271_v37 = vadd.f32 0.001, %v270_v35  ;;  %v291_v41 = vmul.f32 2.0, %v261_v40 }
  0xf5   : > { %v280_v36 = vpop.xlane.xlu0 %279  ;;  %v290_v42 = vpop.xlane.xlu1 %289 }
  0xf6   : > { %v281_v38 = vadd.f32 0.001, %v280_v36  ;;  %v296_v45 = vmul.f32 0.0009765625, %v290_v42 }
  0xf8   : > { %v292_v39 = vadd.f32 %v281_v38, %v271_v37 }
  0xfa   : > { %497 = vrcp.f32 %v292_v39 }
 0x107   : > { %v498_v43 = vpop.eup %497 }
 0x108   : > { %v294_v44 = vmul.f32 %v498_v43, %v291_v41 }
 0x10a   : > { %v295_v46 = vsub.f32 1.0, %v294_v44 }
 0x10c   : > { %v297_v47 = vadd.f32 %v296_v45, %v295_v46 }
 0x10e   : > { %298 = vst [vmem:[%s212_s18] sm:$0x1] %v297_v47 }
 0x10f   : > { %568 = shalt.err (!%p565_p6)
}
 0x110   : > { %s569_s4 = scalar_lea.hbm %s310_s29, 16  ;;  %s573_s26 = scalar_lea.hbm %s823_s2, 32 }
 0x111   : > { %p570_p7 = scmp.ne.s32.totalorder %s310_s29, %s569_s4  ;;  %p574_p4 = scmp.lt.s32.totalorder %s310_s29, %s823_s2 }
 0x112   : > { %p575_p10 = scmp.lt.s32.totalorder %s573_s26, %s569_s4 }
 0x113   : > { %p571_p1 = pnand %p570_p7, %p710_p9 }
 0x114   : > { %p576_p8 = por %p575_p10, %p574_p4 }
 0x115   : > { %p572_p2 = pneg %p571_p1 }
 0x117   : > { %p577_p0 = pnand %p576_p8, %p572_p2 }
 0x119   : > { %580 = shalt.err (!%p577_p0)
}
 0x11a   : > { %430 = dma.vmem_to_hbm [thread:$0]  (%p710_p9), %s313_s19, 16, %s310_s29, %s300_s3  }
 0x11b PF: > { %s324_s5 = sand.u32 1, %s619_s9   ;;  %p830_p3 = scmp.ge.s32.totalorder %s639_s14, 2 }
 0x11c   : > { %s325_s16 = scalar_lea.sflag [#allocation8], %s324_s5 }
 0x11d   : > { %p440_p13 = pnand %p830_p3, %p717_p11 }
 0x11f   : > { %p441_p5 = pneg %p440_p13 }
 0x121   : > { %614 = dma.done.wait (%p441_p5), %s325_s16, 16  }
 0x122   : > { %616 = vsyncadd (%p441_p5), %s325_s16, 4294967280  ;;  %s21_s14 = sadd.s32 1, %s639_s14   ;;  %s831_s9 = smov %s623_s10 }
 0x123   : > { %p18_p12 = scmp.ge.s32.totalorder %s21_s14, 4   ;;  %s832_s10 = smov %s627_s11 }
 0x124   : > { %s833_s11 = smov %s715_s23  ;;  %s834_s12 = smov %s635_s13 }
 0x125   : > { %s835_s13 = smov %s837_s17  ;;  %20 = sbr.rel (!%p18_p12) target bundleno = 8 (0x8), region = 94 }
 0x12a   :  { %329 = vsyncpa [#allocation7], 1 }
 0x12b   :  { %331 = vsyncpa [#allocation7 + $0x1], 1 }
 0x12c   :  { %332 = vsyncpa [#allocation10], 1 }
 0x12d   :  { %334 = vsyncpa [#allocation10 + $0x1], 1 }
 0x12e   :  { %335 = vsyncpa [#allocation8], 1 }
 0x12f   :  { %337 = vsyncpa [#allocation8 + $0x1], 1 }

</bundles_post_ra>
